<compile_context>
chip_gen: v6e
topology: v6e:2x2x1
jax: 0.10.0
libtpu: 0.0.40
codegen_flags: <defaults>
</compile_context>

<pallas_src>
import jax
import jax.numpy as jnp
from jax.experimental import pallas as pl
from jax.experimental.pallas import tpu as pltpu

LAMBDA = 0.5          # nn.Softshrink() default lambd
INPUT_SIZE = 784
HIDDEN = 256
OUTPUT_SIZE = 10
OUT_PAD = 128         # lane-dense final store; wrapper slices back to 10


def _softshrink(y):
    # relu-form Softshrink: identical to PyTorch (strict >lambda / <-lambda, 0 on
    # [-lambda, lambda]); 2 max + 2 add on the VPU instead of nested selects.
    return jnp.maximum(y - LAMBDA, 0.0) - jnp.maximum(-y - LAMBDA, 0.0)


def _fused_mlp_kernel(x_ref, w1_ref, w23_ref, w4_ref, b_ref, o_ref):
    """Fused 4-layer MLP forward, everything resident in VMEM/vregs.

    x:   (B, 784)      bf16
    w1:  (784, 256)    bf16
    w23: (2, 256, 256) bf16   (layers 2 and 3)
    w4:  (256, 128)    bf16   (output columns 10..127 are zero)
    b:   (4, 256)      f32    (row 3 holds b4 in its first 10 entries, rest zero)
    o:   (B, 128)      f32
    """
    h = jnp.dot(x_ref[...], w1_ref[...],
                preferred_element_type=jnp.float32) + b_ref[0:1, :]
    h = _softshrink(h)
    h = jnp.dot(h.astype(jnp.bfloat16), w23_ref[0],
                preferred_element_type=jnp.float32) + b_ref[1:2, :]
    h = _softshrink(h)
    h = jnp.dot(h.astype(jnp.bfloat16), w23_ref[1],
                preferred_element_type=jnp.float32) + b_ref[2:3, :]
    h = _softshrink(h)
    h = jnp.dot(h.astype(jnp.bfloat16), w4_ref[...],
                preferred_element_type=jnp.float32) + b_ref[3:4, :OUT_PAD]
    o_ref[...] = h                                   # (B, OUT_PAD) f32, lane-dense


def _cost_estimate(batch):
    macs = batch * (INPUT_SIZE * HIDDEN + 2 * HIDDEN * HIDDEN + HIDDEN * OUT_PAD)
    byts = (batch * INPUT_SIZE * 2            # x bf16
            + INPUT_SIZE * HIDDEN * 2         # w1 bf16
            + 2 * HIDDEN * HIDDEN * 2         # w2/w3 bf16
            + HIDDEN * OUT_PAD * 2            # w4 bf16
            + 4 * HIDDEN * 4                  # biases f32
            + batch * OUT_PAD * 4)            # output f32
    return pl.CostEstimate(flops=2 * macs, bytes_accessed=byts, transcendentals=0)


def _call_kernel(x, params):
    """Returns the padded (B, OUT_PAD) kernel output."""
    w1, w23, w4, b = params
    B = x.shape[0]
    return pl.pallas_call(
        _fused_mlp_kernel,
        out_shape=jax.ShapeDtypeStruct((B, OUT_PAD), jnp.float32),
        in_specs=[pl.BlockSpec(memory_space=pltpu.MemorySpace.VMEM)] * 5,
        out_specs=pl.BlockSpec(memory_space=pltpu.MemorySpace.VMEM),
        cost_estimate=_cost_estimate(B),
    )(x.astype(jnp.bfloat16), w1, w23, w4, b)


def fused_forward(x, params):
    """x: (B, 784) f32; params: (w1, w23, w4, b)."""
    return _call_kernel(x, params)[:, :OUTPUT_SIZE]


softshrink_model = jax.jit(fused_forward)
_softshrink_model_padded = jax.jit(_call_kernel)   # for the structural zero-pad check


def init_params(key, input_size=INPUT_SIZE, lin1=HIDDEN, lin2=HIDDEN,
                lin3=HIDDEN, out=OUTPUT_SIZE):
    """PyTorch-Linear-style init U[-1/sqrt(fan_in), 1/sqrt(fan_in)].

    Weights stored transposed (in, out) in bf16; w2/w3 stacked, w4/b4 columns
    zero-padded to OUT_PAD / HIDDEN so padded outputs are exactly 0.
    """
    dims = [(input_size, lin1), (lin1, lin2), (lin2, lin3), (lin3, out)]
    ws, bs = [], []
    for fan_in, fan_out in dims:
        key, kw, kb = jax.random.split(key, 3)
        bound = 1.0 / jnp.sqrt(fan_in)
        ws.append(jax.random.uniform(kw, (fan_in, fan_out), jnp.float32, -bound, bound))
        bs.append(jax.random.uniform(kb, (fan_out,), jnp.float32, -bound, bound))
    w1 = ws[0].astype(jnp.bfloat16)                                  # (784, 256)
    w23 = jnp.stack([ws[1], ws[2]]).astype(jnp.bfloat16)             # (2, 256, 256)
    w4 = jnp.pad(ws[3], ((0, 0), (0, OUT_PAD - out))).astype(jnp.bfloat16)  # (256, 128)
    b = jnp.stack([bs[0], bs[1], bs[2],
                   jnp.pad(bs[3], (0, HIDDEN - out))])               # (4, 256) f32
    return (w1, w23, w4, b)


def softshrink_model_ref(x, params):
    """Pure-JAX reference mirroring the kernel numerics (bf16 operands, f32 acc)."""
    w1, w23, w4, b = params
    def shrink(h):
        return jnp.where(h > LAMBDA, h - LAMBDA,
                         jnp.where(h < -LAMBDA, h + LAMBDA, 0.0))
    h = jnp.dot(x.astype(jnp.bfloat16), w1, preferred_element_type=jnp.float32) + b[0]
    h = shrink(h)
    h = jnp.dot(h.astype(jnp.bfloat16), w23[0], preferred_element_type=jnp.float32) + b[1]
    h = shrink(h)
    h = jnp.dot(h.astype(jnp.bfloat16), w23[1], preferred_element_type=jnp.float32) + b[2]
    h = shrink(h)
    h = jnp.dot(h.astype(jnp.bfloat16), w4, preferred_element_type=jnp.float32) + b[3][:OUT_PAD]
    return h[:, :OUTPUT_SIZE]


if __name__ == "__main__":
    key = jax.random.PRNGKey(0)
    key, kx = jax.random.split(key)
    batch = 8
    x = jax.random.normal(kx, (batch, INPUT_SIZE), jnp.float32)
    params = init_params(key)

    out = softshrink_model(x, params)
    out = jax.block_until_ready(out)

    # Numeric check vs pure-JAX reference.
    ref = softshrink_model_ref(x, params)
    assert out.shape == (batch, OUTPUT_SIZE), out.shape
    assert jnp.allclose(out, ref, atol=1e-2, rtol=1e-2), "mismatch vs reference"

    # Structural check: padded output columns 10..127 must be exactly zero.
    out_pad = jax.block_until_ready(_softshrink_model_padded(x, params))
    assert bool(jnp.all(out_pad[:, OUTPUT_SIZE:] == 0.0)), "padded columns not zero"

    print("KERNEL_OK")
</pallas_src>

<mosaic_0001>
module attributes {stable_mosaic.version = 11 : i64} {
  func.func @_fused_mlp_kernel(%arg0: memref<8x784xbf16, #tpu.memory_space<vmem>>, %arg1: memref<784x256xbf16, #tpu.memory_space<vmem>>, %arg2: memref<2x256x256xbf16, #tpu.memory_space<vmem>>, %arg3: memref<256x128xbf16, #tpu.memory_space<vmem>>, %arg4: memref<4x256xf32, #tpu.memory_space<vmem>>, %arg5: memref<8x128xf32, #tpu.memory_space<vmem>>) attributes {dimension_semantics = [], scalar_prefetch = 0 : i64, scratch_operands = 0 : i64, tpu.core_type = #tpu.core_type<tc>} {
    %c0 = arith.constant 0 : index
    %c0_0 = arith.constant 0 : index
    %0 = vector.load %arg0[%c0, %c0_0] : memref<8x784xbf16, #tpu.memory_space<vmem>>, vector<8x784xbf16>
    %c0_1 = arith.constant 0 : index
    %c0_2 = arith.constant 0 : index
    %1 = vector.load %arg1[%c0_1, %c0_2] : memref<784x256xbf16, #tpu.memory_space<vmem>>, vector<784x256xbf16>
    %cst = arith.constant dense<0.000000e+00> : vector<8x256xf32>
    %2 = tpu.matmul %0, %1, %cst {dimension_numbers = #tpu.dot_dimension_numbers<[1], [0], [0], [1], [0, 0, 1, 1], [], []>} : vector<8x784xbf16>, vector<784x256xbf16>, vector<8x256xf32> -> vector<8x256xf32>
    %c0_3 = arith.constant 0 : index
    %c0_4 = arith.constant 0 : index
    %3 = vector.load %arg4[%c0_3, %c0_4] : memref<4x256xf32, #tpu.memory_space<vmem>>, vector<1x256xf32>
    %4 = vector.broadcast %3 : vector<1x256xf32> to vector<8x256xf32>
    %5 = arith.addf %2, %4 : vector<8x256xf32>
    %cst_5 = arith.constant 5.000000e-01 : f32
    %6 = vector.broadcast %cst_5 : f32 to vector<8x256xf32>
    %7 = arith.subf %5, %6 : vector<8x256xf32>
    %cst_6 = arith.constant 0.000000e+00 : f32
    %8 = vector.broadcast %cst_6 : f32 to vector<8x256xf32>
    %9 = arith.maximumf %7, %8 : vector<8x256xf32>
    %cst_7 = arith.constant 0.000000e+00 : f32
    %10 = vector.broadcast %cst_7 : f32 to vector<8x256xf32>
    %11 = arith.subf %10, %5 : vector<8x256xf32>
    %cst_8 = arith.constant 5.000000e-01 : f32
    %12 = vector.broadcast %cst_8 : f32 to vector<8x256xf32>
    %13 = arith.subf %11, %12 : vector<8x256xf32>
    %cst_9 = arith.constant 0.000000e+00 : f32
    %14 = vector.broadcast %cst_9 : f32 to vector<8x256xf32>
    %15 = arith.maximumf %13, %14 : vector<8x256xf32>
    %16 = arith.subf %9, %15 : vector<8x256xf32>
    %17 = arith.truncf %16 : vector<8x256xf32> to vector<8x256xbf16>
    %c0_10 = arith.constant 0 : index
    %c0_11 = arith.constant 0 : index
    %c0_12 = arith.constant 0 : index
    %18 = vector.load %arg2[%c0_10, %c0_11, %c0_12] : memref<2x256x256xbf16, #tpu.memory_space<vmem>>, vector<1x256x256xbf16>
    %19 = vector.shape_cast %18 : vector<1x256x256xbf16> to vector<256x256xbf16>
    %cst_13 = arith.constant dense<0.000000e+00> : vector<8x256xf32>
    %20 = tpu.matmul %17, %19, %cst_13 {dimension_numbers = #tpu.dot_dimension_numbers<[1], [0], [0], [1], [0, 0, 1, 1], [], []>} : vector<8x256xbf16>, vector<256x256xbf16>, vector<8x256xf32> -> vector<8x256xf32>
    %c1 = arith.constant 1 : index
    %c0_14 = arith.constant 0 : index
    %21 = vector.load %arg4[%c1, %c0_14] : memref<4x256xf32, #tpu.memory_space<vmem>>, vector<1x256xf32>
    %22 = vector.broadcast %21 : vector<1x256xf32> to vector<8x256xf32>
    %23 = arith.addf %20, %22 : vector<8x256xf32>
    %cst_15 = arith.constant 5.000000e-01 : f32
    %24 = vector.broadcast %cst_15 : f32 to vector<8x256xf32>
    %25 = arith.subf %23, %24 : vector<8x256xf32>
    %cst_16 = arith.constant 0.000000e+00 : f32
    %26 = vector.broadcast %cst_16 : f32 to vector<8x256xf32>
    %27 = arith.maximumf %25, %26 : vector<8x256xf32>
    %cst_17 = arith.constant 0.000000e+00 : f32
    %28 = vector.broadcast %cst_17 : f32 to vector<8x256xf32>
    %29 = arith.subf %28, %23 : vector<8x256xf32>
    %cst_18 = arith.constant 5.000000e-01 : f32
    %30 = vector.broadcast %cst_18 : f32 to vector<8x256xf32>
    %31 = arith.subf %29, %30 : vector<8x256xf32>
    %cst_19 = arith.constant 0.000000e+00 : f32
    %32 = vector.broadcast %cst_19 : f32 to vector<8x256xf32>
    %33 = arith.maximumf %31, %32 : vector<8x256xf32>
    %34 = arith.subf %27, %33 : vector<8x256xf32>
    %35 = arith.truncf %34 : vector<8x256xf32> to vector<8x256xbf16>
    %c1_20 = arith.constant 1 : index
    %c0_21 = arith.constant 0 : index
    %c0_22 = arith.constant 0 : index
    %36 = vector.load %arg2[%c1_20, %c0_21, %c0_22] : memref<2x256x256xbf16, #tpu.memory_space<vmem>>, vector<1x256x256xbf16>
    %37 = vector.shape_cast %36 : vector<1x256x256xbf16> to vector<256x256xbf16>
    %cst_23 = arith.constant dense<0.000000e+00> : vector<8x256xf32>
    %38 = tpu.matmul %35, %37, %cst_23 {dimension_numbers = #tpu.dot_dimension_numbers<[1], [0], [0], [1], [0, 0, 1, 1], [], []>} : vector<8x256xbf16>, vector<256x256xbf16>, vector<8x256xf32> -> vector<8x256xf32>
    %c2 = arith.constant 2 : index
    %c0_24 = arith.constant 0 : index
    %39 = vector.load %arg4[%c2, %c0_24] : memref<4x256xf32, #tpu.memory_space<vmem>>, vector<1x256xf32>
    %40 = vector.broadcast %39 : vector<1x256xf32> to vector<8x256xf32>
    %41 = arith.addf %38, %40 : vector<8x256xf32>
    %cst_25 = arith.constant 5.000000e-01 : f32
    %42 = vector.broadcast %cst_25 : f32 to vector<8x256xf32>
    %43 = arith.subf %41, %42 : vector<8x256xf32>
    %cst_26 = arith.constant 0.000000e+00 : f32
    %44 = vector.broadcast %cst_26 : f32 to vector<8x256xf32>
    %45 = arith.maximumf %43, %44 : vector<8x256xf32>
    %cst_27 = arith.constant 0.000000e+00 : f32
    %46 = vector.broadcast %cst_27 : f32 to vector<8x256xf32>
    %47 = arith.subf %46, %41 : vector<8x256xf32>
    %cst_28 = arith.constant 5.000000e-01 : f32
    %48 = vector.broadcast %cst_28 : f32 to vector<8x256xf32>
    %49 = arith.subf %47, %48 : vector<8x256xf32>
    %cst_29 = arith.constant 0.000000e+00 : f32
    %50 = vector.broadcast %cst_29 : f32 to vector<8x256xf32>
    %51 = arith.maximumf %49, %50 : vector<8x256xf32>
    %52 = arith.subf %45, %51 : vector<8x256xf32>
    %53 = arith.truncf %52 : vector<8x256xf32> to vector<8x256xbf16>
    %c0_30 = arith.constant 0 : index
    %c0_31 = arith.constant 0 : index
    %54 = vector.load %arg3[%c0_30, %c0_31] : memref<256x128xbf16, #tpu.memory_space<vmem>>, vector<256x128xbf16>
    %cst_32 = arith.constant dense<0.000000e+00> : vector<8x128xf32>
    %55 = tpu.matmul %53, %54, %cst_32 {dimension_numbers = #tpu.dot_dimension_numbers<[1], [0], [0], [1], [0, 0, 1, 1], [], []>} : vector<8x256xbf16>, vector<256x128xbf16>, vector<8x128xf32> -> vector<8x128xf32>
    %c3 = arith.constant 3 : index
    %c0_33 = arith.constant 0 : index
    %56 = vector.load %arg4[%c3, %c0_33] : memref<4x256xf32, #tpu.memory_space<vmem>>, vector<1x128xf32>
    %57 = vector.broadcast %56 : vector<1x128xf32> to vector<8x128xf32>
    %58 = arith.addf %55, %57 : vector<8x128xf32>
    %c0_34 = arith.constant 0 : index
    %c0_35 = arith.constant 0 : index
    %59 = vector.load %arg5[%c0_34, %c0_35] : memref<8x128xf32, #tpu.memory_space<vmem>>, vector<8x128xf32>
    tpu.vector_store %arg5[%c0_34, %c0_35], %58 {strides = array<i32>} : memref<8x128xf32, #tpu.memory_space<vmem>>, vector<8x128xf32>,
    return
  }
}

</mosaic_0001>

<bundles_post_ra>
// kernel: fused_forward.1
= control target key start
LH: loop header
LB: loop body
LE: loop exit
PB: predicated region body
PF: predicated region fallthrough
CT: control target
= control target key end

     0   :  { %10 = vsyncpa [#allocation3], 0  ;;  %s2259_s0 = inlined_call_operand.vmem [shape: bf16[8,784], index: 0, kind: input, shape index: {}]   ;;  %s2260_s1 = inlined_call_operand.hbm [shape: bf16[784,256], index: 1, kind: input, shape index: {}]   ;;  %s2261_s2 = inlined_call_operand.hbm [shape: bf16[2,256,256], index: 2, kind: input, shape index: {}]   ;;  %s2262_s3 = inlined_call_operand.hbm [shape: bf16[256,128], index: 3, kind: input, shape index: {}]   ;;  %s2263_s4 = inlined_call_operand.vmem [shape: f32[4,256], index: 4, kind: input, shape index: {}]   ;;  %s2264_s5 = inlined_call_operand.hbm [shape: f32[8,128], index: 5, kind: output, shape index: {}]  }
   0x1   :  { %11 = vsyncpa [#allocation6], 0 }
   0x2   :  { %12 = vsyncpa [#allocation4], 0  ;;  %s2168_s18 = smov [#allocation5]   ;;  %s2169_s20 = smov [#allocation2]  }
   0x3   :  { %s32_s19 = sshll.u32 %s2168_s18, 4  ;;  %s20_s21 = sshll.u32 %s2169_s20, 4  ;;  %s33_s19 = int_to_ptr.vmem [resolvable:$true] %s32_s19  ;;  %s21_s21 = int_to_ptr.vmem [resolvable:$true] %s20_s21 }
   0x4   :  { %s2090_s22 = scalar_lea.vmem %s33_s19, 8192  ;;  %p2095_p1 = scmp.lt.s32.totalorder %s33_s19, %s33_s19 }
   0x5   :  { %p2091_p0 = scmp.ne.s32.totalorder %s33_s19, %s2090_s22  ;;  %p2096_p2 = scmp.lt.s32.totalorder %s2090_s22, %s2090_s22 }
   0x7   :  { %p2097_p3 = por %p2096_p2, %p2095_p1 }
   0x9   :  { %p2098_p4 = pnand %p2097_p3, %p2091_p0 }
   0xb   :  { %2101 = shalt.err (!%p2098_p4)
}
   0xc   :  { %s2170_s23 = smov 128   ;;  %s2171_s24 = smov 8  }
   0xd   :  { %38 = dma.hbm_to_vmem [thread:$0]  %s2261_s2, 8192, %s33_s19, [#allocation6], %s2170_s23, %s2170_s23, %s2171_s24  }
   0xe   :  { %s2110_s27 = scalar_lea.vmem %s21_s21, 12544  ;;  %p2115_p6 = scmp.lt.s32.totalorder %s21_s21, %s21_s21 }
   0xf   :  { %p2111_p5 = scmp.ne.s32.totalorder %s21_s21, %s2110_s27  ;;  %p2116_p7 = scmp.lt.s32.totalorder %s2110_s27, %s2110_s27 }
  0x11   :  { %p2117_p8 = por %p2116_p7, %p2115_p6 }
  0x13   :  { %p2118_p9 = pnand %p2117_p8, %p2111_p5 }
  0x15   :  { %2121 = shalt.err (!%p2118_p9)
}
  0x16   :  { %26 = dma.hbm_to_vmem [thread:$0]  %s2260_s1, 12544, %s21_s21, [#allocation3], %s2170_s23, %s2170_s23, %s2171_s24  }
  0x17   :  { %s2172_s30 = smov [#allocation7]  }
  0x18   :  { %s44_s6 = sshll.u32 %s2172_s30, 4  ;;  %s45_s6 = int_to_ptr.vmem [resolvable:$true] %s44_s6 }
  0x19   :  { %s2130_s7 = scalar_lea.vmem %s45_s6, 2048  ;;  %p2135_p11 = scmp.lt.s32.totalorder %s45_s6, %s45_s6 }
  0x1a   :  { %p2131_p10 = scmp.ne.s32.totalorder %s45_s6, %s2130_s7  ;;  %p2136_p12 = scmp.lt.s32.totalorder %s2130_s7, %s2130_s7 }
  0x1c   :  { %p2137_p13 = por %p2136_p12, %p2135_p11 }
  0x1e   :  { %p2138_p0 = pnand %p2137_p13, %p2131_p10 }
  0x20   :  { %2141 = shalt.err (!%p2138_p0)
}
  0x21   :  { %s2173_s2 = smov 64   ;;  %s2174_s8 = smov 4  }
  0x22   :  { %50 = dma.hbm_to_vmem [thread:$0]  %s2262_s3, 2048, %s45_s6, [#allocation6], %s2173_s2, %s2173_s2, %s2174_s8  }
  0x23   :  { %2162 = dma.done.wait [#allocation3], 12544  }
  0x24   :  { %2163 = vsyncadd [#allocation3], 4294954752 }
  0x25   :  { %2164 = dma.done.wait [#allocation6], 10240  }
  0x26   :  { %2165 = vsyncadd [#allocation6], 4294957056  ;;  %v1816_v0 = vld [vmem:[#allocation2 + $0x74] ss:$8 sps:$4 sm:$0xff]   ;;  %v1818_v1 = vld [vmem:[#allocation2 + $0x70] ss:$8 sps:$4 sm:$0xff]  }
  0x27   :  { %695 = vmatprep.subr.bf16.mxu0 %v1816_v0  ;;  %v1819_v2 = vld [vmem:[#allocation2 + $0x174] ss:$8 sps:$4 sm:$0xff]   ;;  %v1821_v3 = vld [vmem:[#allocation2 + $0x170] ss:$8 sps:$4 sm:$0xff]   ;;  %v1822_v4 = vld [vmem:[#allocation2 + $0x64] ss:$8 sps:$4 sm:$0xff]  }
  0x28   :  { %696 = vmatpush1.bf16.msra.mxu0 %v1818_v1  ;;  %v1824_v5 = vld [vmem:[#allocation2 + $0x60] ss:$8 sps:$4 sm:$0xff]   ;;  %736 = vmatprep.subr.bf16.mxu1 %v1819_v2  ;;  %v1825_v6 = vld [vmem:[#allocation2 + $0x164] ss:$8 sps:$4 sm:$0xff]   ;;  %v1828_v8 = vld [vmem:[#allocation2 + $0x54] ss:$8 sps:$4 sm:$0xff]  }
  0x29   :  { %737 = vmatpush1.bf16.msra.mxu1 %v1821_v3  ;;  %697 = vmatprep.subr.bf16.mxu0 %v1822_v4  ;;  %v1827_v7 = vld [vmem:[#allocation2 + $0x160] ss:$8 sps:$4 sm:$0xff]   ;;  %v1830_v9 = vld [vmem:[#allocation2 + $0x50] ss:$8 sps:$4 sm:$0xff]   ;;  %v1831_v10 = vld [vmem:[#allocation2 + $0x154] ss:$8 sps:$4 sm:$0xff]  }
  0x2a   :  { %738 = vmatprep.subr.bf16.mxu1 %v1825_v6  ;;  %v1834_v11 = vld [vmem:[#allocation2 + $0x44] ss:$8 sps:$4 sm:$0xff]   ;;  %v1833_v12 = vld [vmem:[#allocation2 + $0x150] ss:$8 sps:$4 sm:$0xff]   ;;  %v1836_v14 = vld [vmem:[#allocation2 + $0x40] ss:$8 sps:$4 sm:$0xff]  }
  0x2b   :  { %v1837_v13 = vld [vmem:[#allocation2 + $0x144] ss:$8 sps:$4 sm:$0xff]   ;;  %v1840_v15 = vld [vmem:[#allocation2 + $0x34] ss:$8 sps:$4 sm:$0xff]   ;;  %v1839_v16 = vld [vmem:[#allocation2 + $0x140] ss:$8 sps:$4 sm:$0xff]  }
  0x2c   :  { %698 = vmatpush1.bf16.msra.mxu0 %v1824_v5  ;;  %v1843_v17 = vld [vmem:[#allocation2 + $0x134] ss:$8 sps:$4 sm:$0xff]   ;;  %v1842_v18 = vld [vmem:[#allocation2 + $0x30] ss:$8 sps:$4 sm:$0xff]   ;;  %v1846_v19 = vld [vmem:[#allocation2 + $0x24] ss:$8 sps:$4 sm:$0xff]  }
  0x2d   :  { %699 = vmatprep.subr.bf16.mxu0 %v1828_v8  ;;  %739 = vmatpush1.bf16.msra.mxu1 %v1827_v7  ;;  %v1845_v20 = vld [vmem:[#allocation2 + $0x130] ss:$8 sps:$4 sm:$0xff]   ;;  %v1849_v21 = vld [vmem:[#allocation2 + $0x124] ss:$8 sps:$4 sm:$0xff]   ;;  %v1848_v22 = vld [vmem:[#allocation2 + $0x20] ss:$8 sps:$4 sm:$0xff]  }
  0x2e   :  { %740 = vmatprep.subr.bf16.mxu1 %v1831_v10  ;;  %v1852_v23 = vld [vmem:[#allocation2 + $0x14] ss:$8 sps:$4 sm:$0xff]   ;;  %v1851_v24 = vld [vmem:[#allocation2 + $0x120] ss:$8 sps:$4 sm:$0xff]   ;;  %v1854_v26 = vld [vmem:[#allocation2 + $0x10] ss:$8 sps:$4 sm:$0xff]  }
  0x2f   :  { %v1855_v25 = vld [vmem:[#allocation2 + $0x114] ss:$8 sps:$4 sm:$0xff]   ;;  %v1858_v27 = vld [vmem:[#allocation2 + $0x4] ss:$8 sps:$4 sm:$0xff]   ;;  %v1857_v28 = vld [vmem:[#allocation2 + $0x110] ss:$8 sps:$4 sm:$0xff]  }
  0x30   :  { %700 = vmatpush1.bf16.msra.mxu0 %v1830_v9  ;;  %v1861_v29 = vld [vmem:[#allocation2 + $0x104] ss:$8 sps:$4 sm:$0xff]   ;;  %v1860_v30 = vld [vmem:[#allocation2] ss:$8 sps:$4 sm:$0xff]   ;;  %v1864_v31 = vld [vmem:[#allocation2 + $0xf4] ss:$8 sps:$4 sm:$0xff]  }
  0x31   :  { %701 = vmatprep.subr.bf16.mxu0 %v1834_v11  ;;  %741 = vmatpush1.bf16.msra.mxu1 %v1833_v12  ;;  %v1863_v32 = vld [vmem:[#allocation2 + $0x100] ss:$8 sps:$4 sm:$0xff]   ;;  %v1867_v33 = vld [vmem:[#allocation2 + $0x1f4] ss:$8 sps:$4 sm:$0xff]   ;;  %v1866_v34 = vld [vmem:[#allocation2 + $0xf0] ss:$8 sps:$4 sm:$0xff]  }
  0x32   :  { %742 = vmatprep.subr.bf16.mxu1 %v1837_v13  ;;  %v1870_v35 = vld [vmem:[#allocation2 + $0xe4] ss:$8 sps:$4 sm:$0xff]   ;;  %v1869_v36 = vld [vmem:[#allocation2 + $0x1f0] ss:$8 sps:$4 sm:$0xff]   ;;  %v1872_v38 = vld [vmem:[#allocation2 + $0xe0] ss:$8 sps:$4 sm:$0xff]  }
  0x33   :  { %v1873_v37 = vld [vmem:[#allocation2 + $0x1e4] ss:$8 sps:$4 sm:$0xff]   ;;  %v1876_v39 = vld [vmem:[#allocation2 + $0xd4] ss:$8 sps:$4 sm:$0xff]   ;;  %v1875_v40 = vld [vmem:[#allocation2 + $0x1e0] ss:$8 sps:$4 sm:$0xff]  }
  0x34   :  { %702 = vmatpush1.bf16.msra.mxu0 %v1836_v14  ;;  %v1879_v41 = vld [vmem:[#allocation2 + $0x1d4] ss:$8 sps:$4 sm:$0xff]   ;;  %v1878_v42 = vld [vmem:[#allocation2 + $0xd0] ss:$8 sps:$4 sm:$0xff]   ;;  %v1882_v43 = vld [vmem:[#allocation2 + $0xc4] ss:$8 sps:$4 sm:$0xff]  }
  0x35   :  { %703 = vmatprep.subr.bf16.mxu0 %v1840_v15  ;;  %743 = vmatpush1.bf16.msra.mxu1 %v1839_v16  ;;  %v1881_v44 = vld [vmem:[#allocation2 + $0x1d0] ss:$8 sps:$4 sm:$0xff]   ;;  %v1885_v45 = vld [vmem:[#allocation2 + $0x1c4] ss:$8 sps:$4 sm:$0xff]   ;;  %v1884_v47 = vld [vmem:[#allocation2 + $0xc0] ss:$8 sps:$4 sm:$0xff]  }
  0x36   :  { %744 = vmatprep.subr.bf16.mxu1 %v1843_v17  ;;  %v63_v46 = vld [vmem:[%s2259_s0] sm:$0xff]  ;;  %v1888_v49 = vld [vmem:[#allocation2 + $0xb4] ss:$8 sps:$4 sm:$0xff]   ;;  %v64_v50 = vld [vmem:[%s2259_s0 + $0x8] sm:$0xff]  ;;  %v2175_v16 = vmov 0   ;;  %vm691_vm0 = vcmask 130048  }
  0x37   :  { %v1585_v48 = vcombine.high %v63_v46, %v63_v46  ;;  %v1887_v51 = vld [vmem:[#allocation2 + $0x1c0] ss:$8 sps:$4 sm:$0xff]   ;;  %v1587_v52 = vcombine.high %v64_v50, %v64_v50  ;;  %v1891_v53 = vld [vmem:[#allocation2 + $0x1b4] ss:$8 sps:$4 sm:$0xff]   ;;  %v1890_v54 = vld [vmem:[#allocation2 + $0xb0] ss:$8 sps:$4 sm:$0xff]   ;;  %v1584_v5 = vcombine.low %v63_v46, %v63_v46  ;;  %v1586_v7 = vcombine.low %v64_v50, %v64_v50 }
  0x38   :  { %704 = vmatpush1.bf16.msra.mxu0 %v1842_v18  ;;  %v1894_v55 = vld [vmem:[#allocation2 + $0xa4] ss:$8 sps:$4 sm:$0xff]   ;;  %v1893_v56 = vld [vmem:[#allocation2 + $0x1b0] ss:$8 sps:$4 sm:$0xff]   ;;  %v1896_v58 = vld [vmem:[#allocation2 + $0xa0] ss:$8 sps:$4 sm:$0xff]  }
  0x39   :  { %705 = vmatprep.subr.bf16.mxu0 %v1846_v19  ;;  %745 = vmatpush1.bf16.msra.mxu1 %v1845_v20  ;;  %v1897_v57 = vld [vmem:[#allocation2 + $0x1a4] ss:$8 sps:$4 sm:$0xff]   ;;  %v1900_v59 = vld [vmem:[#allocation2 + $0x94] ss:$8 sps:$4 sm:$0xff]   ;;  %v1899_v60 = vld [vmem:[#allocation2 + $0x1a0] ss:$8 sps:$4 sm:$0xff]  }
  0x3a   :  { %746 = vmatprep.subr.bf16.mxu1 %v1849_v21  ;;  %727 = vmatprep.mubr.bf16.mxu0 %v1585_v48  ;;  %v1903_v61 = vld [vmem:[#allocation2 + $0x194] ss:$8 sps:$4 sm:$0xff]   ;;  %v1902_v62 = vld [vmem:[#allocation2 + $0x90] ss:$8 sps:$4 sm:$0xff]   ;;  %v1906_v63 = vld [vmem:[#allocation2 + $0x84] ss:$8 sps:$4 sm:$0xff]  }
  0x3b   :  { %768 = vmatprep.mubr.bf16.mxu1 %v1587_v52  ;;  %v1905_v0 = vld [vmem:[#allocation2 + $0x190] ss:$8 sps:$4 sm:$0xff]   ;;  %v1909_v1 = vld [vmem:[#allocation2 + $0x184] ss:$8 sps:$4 sm:$0xff]   ;;  %v1908_v2 = vld [vmem:[#allocation2 + $0x80] ss:$8 sps:$4 sm:$0xff]  }
  0x3c   :  { %706 = vmatpush1.bf16.msra.mxu0 %v1848_v22  ;;  %v1916_v3 = vld [vmem:[#allocation2 + $0x274] ss:$8 sps:$4 sm:$0xff]   ;;  %v1913_v4 = vld [vmem:[#allocation2 + $0x180] ss:$8 sps:$4 sm:$0xff]   ;;  %v1914_v6 = vld [vmem:[#allocation2 + $0x270] ss:$8 sps:$4 sm:$0xff]  }
  0x3d   :  { %707 = vmatprep.subr.bf16.mxu0 %v1852_v23  ;;  %747 = vmatpush1.bf16.msra.mxu1 %v1851_v24  ;;  %v1921_v8 = vld [vmem:[#allocation2 + $0x264] ss:$8 sps:$4 sm:$0xff]   ;;  %v1961_v10 = vld [vmem:[#allocation2 + $0x300] ss:$8 sps:$4 sm:$0xff]   ;;  %v2225_v12 = vld [vmem:[%s2259_s0 + $0x10] sm:$0xff]  ;;  %s2176_s24 = smov [#allocation8]  }
  0x3e   :  { %748 = vmatprep.subr.bf16.mxu1 %v1855_v25  ;;  %v1963_v9 = vld [vmem:[#allocation2 + $0x304] ss:$8 sps:$4 sm:$0xff]   ;;  %v1919_v11 = vld [vmem:[#allocation2 + $0x260] ss:$8 sps:$4 sm:$0xff]   ;;  %v1924_v13 = vld [vmem:[#allocation2 + $0x254] ss:$8 sps:$4 sm:$0xff]   ;;  %v1589_v14 = vcombine.high %v2225_v12, %v2225_v12 }
  0x3f   :  { %v1922_v15 = vld [vmem:[#allocation2 + $0x250] ss:$8 sps:$4 sm:$0xff]   ;;  %v1927_v17 = vld [vmem:[#allocation2 + $0x244] ss:$8 sps:$4 sm:$0xff]   ;;  %v1925_v19 = vld [vmem:[#allocation2 + $0x240] ss:$8 sps:$4 sm:$0xff]  }
  0x40   :  { %708 = vmatpush1.bf16.msra.mxu0 %v1854_v26  ;;  %v1967_v18 = vld [vmem:[%s2259_s0 + $0x18] ss:$0 sps:$4 sm:$0xff]   ;;  %v1930_v20 = vld [vmem:[#allocation2 + $0x234] ss:$8 sps:$4 sm:$0xff]   ;;  %v1933_v22 = vld [vmem:[#allocation2 + $0x224] ss:$8 sps:$4 sm:$0xff]  }
  0x41   :  { %709 = vmatprep.subr.bf16.mxu0 %v1858_v27  ;;  %749 = vmatpush1.bf16.msra.mxu1 %v1857_v28  ;;  %v1928_v21 = vld [vmem:[#allocation2 + $0x230] ss:$8 sps:$4 sm:$0xff]   ;;  %v1931_v23 = vld [vmem:[#allocation2 + $0x220] ss:$8 sps:$4 sm:$0xff]   ;;  %v1936_v24 = vld [vmem:[#allocation2 + $0x214] ss:$8 sps:$4 sm:$0xff]  }
  0x42   :  { %750 = vmatprep.subr.bf16.mxu1 %v1861_v29  ;;  %v1934_v25 = vld [vmem:[#allocation2 + $0x210] ss:$8 sps:$4 sm:$0xff]   ;;  %v1939_v26 = vld [vmem:[#allocation2 + $0x204] ss:$8 sps:$4 sm:$0xff]   ;;  %v1937_v27 = vld [vmem:[#allocation2 + $0x200] ss:$8 sps:$4 sm:$0xff]  }
  0x43   :  { %v1942_v28 = vld [vmem:[#allocation2 + $0x2f4] ss:$8 sps:$4 sm:$0xff]   ;;  %v1940_v29 = vld [vmem:[#allocation2 + $0x2f0] ss:$8 sps:$4 sm:$0xff]   ;;  %v1972_v46 = vld [vmem:[#allocation5 + $0x74] ss:$8 sps:$4 sm:$0xff]  }
  0x44   :  { %710 = vmatpush1.bf16.msra.mxu0 %v1860_v30  ;;  %v1945_v30 = vld [vmem:[#allocation2 + $0x2e4] ss:$8 sps:$4 sm:$0xff]   ;;  %v1973_v48 = vld [vmem:[#allocation5 + $0x60] ss:$8 sps:$4 sm:$0xff]   ;;  %v1976_v50 = vld [vmem:[#allocation5 + $0x50] ss:$8 sps:$4 sm:$0xff]  }
  0x45   :  { %711 = vmatprep.subr.bf16.mxu0 %v1864_v31  ;;  %751 = vmatpush1.bf16.msra.mxu1 %v1863_v32  ;;  %v1943_v31 = vld [vmem:[#allocation2 + $0x2e0] ss:$8 sps:$4 sm:$0xff]   ;;  %v1948_v32 = vld [vmem:[#allocation2 + $0x2d4] ss:$8 sps:$4 sm:$0xff]   ;;  %v1979_v52 = vld [vmem:[#allocation5 + $0x40] ss:$8 sps:$4 sm:$0xff]  }
  0x46   :  { %752 = vmatprep.subr.bf16.mxu1 %v1867_v33  ;;  %v1946_v33 = vld [vmem:[#allocation2 + $0x2d0] ss:$8 sps:$4 sm:$0xff]   ;;  %s1574_s25 = sshll.u32 %s2176_s24, 4  ;;  %s1575_s25 = int_to_ptr.vmem [resolvable:$true] %s1574_s25 }
  0x47   :  { %s2142_s26 = scalar_lea.vmem %s1575_s25, 128  ;;  %p2147_p2 = scmp.lt.s32.totalorder %s1575_s25, %s1575_s25 }
  0x48   :  { %712 = vmatpush2.bf16.msra.mxu0 %v1866_v34  ;;  %v1951_v34 = vld [vmem:[#allocation2 + $0x2c4] ss:$8 sps:$4 sm:$0xff]   ;;  %p2143_p1 = scmp.ne.s32.totalorder %s1575_s25, %s2142_s26  ;;  %p2148_p3 = scmp.lt.s32.totalorder %s2142_s26, %s2142_s26 }
  0x49   :  { %713 = vmatprep.subr.bf16.mxu0 %v1870_v35  ;;  %753 = vmatpush2.bf16.msra.mxu1 %v1869_v36  ;;  %v1949_v35 = vld [vmem:[#allocation2 + $0x2c0] ss:$8 sps:$4 sm:$0xff]   ;;  %v1954_v36 = vld [vmem:[#allocation2 + $0x2b4] ss:$8 sps:$4 sm:$0xff]  }
  0x4a   :  { %754 = vmatprep.subr.bf16.mxu1 %v1873_v37  ;;  %v1952_v37 = vld [vmem:[#allocation2 + $0x2b0] ss:$8 sps:$4 sm:$0xff]   ;;  %p2149_p4 = por %p2148_p3, %p2147_p2 }
  0x4c   :  { %714 = vmatpush2.bf16.msra.mxu0 %v1872_v38  ;;  %v1957_v38 = vld [vmem:[#allocation2 + $0x2a4] ss:$8 sps:$4 sm:$0xff]   ;;  %p2150_p5 = pnand %p2149_p4, %p2143_p1 }
  0x4d   :  { %715 = vmatprep.subr.bf16.mxu0 %v1876_v39  ;;  %755 = vmatpush2.bf16.msra.mxu1 %v1875_v40  ;;  %v1955_v39 = vld [vmem:[#allocation2 + $0x2a0] ss:$8 sps:$4 sm:$0xff]   ;;  %v1960_v40 = vld [vmem:[#allocation2 + $0x294] ss:$8 sps:$4 sm:$0xff]  }
  0x4e   :  { %756 = vmatprep.subr.bf16.mxu1 %v1879_v41  ;;  %v1958_v41 = vld [vmem:[#allocation2 + $0x290] ss:$8 sps:$4 sm:$0xff]  }
  0x50   :  { %716 = vmatpush2.bf16.msra.mxu0 %v1878_v42  ;;  %v1966_v42 = vld [vmem:[#allocation2 + $0x284] ss:$8 sps:$4 sm:$0xff]  }
  0x51   :  { %717 = vmatprep.subr.bf16.mxu0 %v1882_v43  ;;  %757 = vmatpush2.bf16.msra.mxu1 %v1881_v44  ;;  %v1964_v43 = vld [vmem:[#allocation2 + $0x280] ss:$8 sps:$4 sm:$0xff]   ;;  %v1588_v44 = vcombine.low %v2225_v12, %v2225_v12  ;;  %v2017_v12 = vld [vmem:[#allocation5 + $0x84] ss:$8 sps:$4 sm:$0xff]  }
  0x52   :  { %758 = vmatprep.subr.bf16.mxu1 %v1885_v45  ;;  %v1970_v45 = vld [vmem:[#allocation5 + $0x70] ss:$8 sps:$4 sm:$0xff]  }
  0x54   :  { %718 = vmatpush2.bf16.msra.mxu0 %v1884_v47  ;;  %v1975_v47 = vld [vmem:[#allocation5 + $0x64] ss:$8 sps:$4 sm:$0xff]  }
  0x55   :  { %719 = vmatprep.subr.bf16.mxu0 %v1888_v49  ;;  %759 = vmatpush2.bf16.msra.mxu1 %v1887_v51  ;;  %v1978_v49 = vld [vmem:[#allocation5 + $0x54] ss:$8 sps:$4 sm:$0xff]   ;;  %v1981_v51 = vld [vmem:[#allocation5 + $0x44] ss:$8 sps:$4 sm:$0xff]  }
  0x56   :  { %760 = vmatprep.subr.bf16.mxu1 %v1891_v53  ;;  %v1984_v53 = vld [vmem:[#allocation5 + $0x34] ss:$8 sps:$4 sm:$0xff]  }
  0x58   :  { %720 = vmatpush2.bf16.msra.mxu0 %v1890_v54  ;;  %v1982_v54 = vld [vmem:[#allocation5 + $0x30] ss:$8 sps:$4 sm:$0xff]  }
  0x59   :  { %721 = vmatprep.subr.bf16.mxu0 %v1894_v55  ;;  %761 = vmatpush2.bf16.msra.mxu1 %v1893_v56  ;;  %v1987_v55 = vld [vmem:[#allocation5 + $0x24] ss:$8 sps:$4 sm:$0xff]   ;;  %v1985_v56 = vld [vmem:[#allocation5 + $0x20] ss:$8 sps:$4 sm:$0xff]  }
  0x5a   :  { %762 = vmatprep.subr.bf16.mxu1 %v1897_v57  ;;  %v1990_v57 = vld [vmem:[#allocation5 + $0x14] ss:$8 sps:$4 sm:$0xff]  }
  0x5c   :  { %722 = vmatpush2.bf16.msra.mxu0 %v1896_v58  ;;  %v1988_v58 = vld [vmem:[#allocation5 + $0x10] ss:$8 sps:$4 sm:$0xff]  }
  0x5d   :  { %723 = vmatprep.subr.bf16.mxu0 %v1900_v59  ;;  %763 = vmatpush2.bf16.msra.mxu1 %v1899_v60  ;;  %v1993_v59 = vld [vmem:[#allocation5 + $0x4] ss:$8 sps:$4 sm:$0xff]   ;;  %v1991_v60 = vld [vmem:[#allocation5] ss:$8 sps:$4 sm:$0xff]  }
  0x5e   :  { %764 = vmatprep.subr.bf16.mxu1 %v1903_v61  ;;  %v1996_v61 = vld [vmem:[#allocation5 + $0xf4] ss:$8 sps:$4 sm:$0xff]  }
  0x60   :  { %724 = vmatpush2.bf16.msra.mxu0 %v1902_v62  ;;  %v1994_v62 = vld [vmem:[#allocation5 + $0xf0] ss:$8 sps:$4 sm:$0xff]  }
  0x61   :  { %725 = vmatprep.subr.bf16.mxu0 %v1906_v63  ;;  %765 = vmatpush2.bf16.msra.mxu1 %v1905_v0  ;;  %v1999_v63 = vld [vmem:[#allocation5 + $0xe4] ss:$8 sps:$4 sm:$0xff]   ;;  %v1997_v0 = vld [vmem:[#allocation5 + $0xe0] ss:$8 sps:$4 sm:$0xff]  }
  0x62   :  { %766 = vmatprep.subr.bf16.mxu1 %v1909_v1  ;;  %v2002_v1 = vld [vmem:[#allocation5 + $0xd4] ss:$8 sps:$4 sm:$0xff]  }
  0x64   :  { %726 = vmatpush2.bf16.msra.mxu0 %v1908_v2  ;;  %v2000_v2 = vld [vmem:[#allocation5 + $0xd0] ss:$8 sps:$4 sm:$0xff]  }
  0x65   :  { %777 = vmatprep.subr.bf16.mxu0 %v1916_v3  ;;  %767 = vmatpush2.bf16.msra.mxu1 %v1913_v4  ;;  %v2005_v3 = vld [vmem:[#allocation5 + $0xc4] ss:$8 sps:$4 sm:$0xff]   ;;  %v2003_v4 = vld [vmem:[#allocation5 + $0xc0] ss:$8 sps:$4 sm:$0xff]  }
  0x66   :  { %832 = vmatprep.subr.bf16.mxu1 %v1963_v9  ;;  %v2014_v9 = vld [vmem:[#allocation5 + $0x94] ss:$8 sps:$4 sm:$0xff]  }
  0x67   :  { %728 = vmatmul.mubr.bf16.vlgmr.msra.gmra.mxu0 %v1584_v5  ;;  %v2008_v5 = vld [vmem:[#allocation5 + $0xb4] ss:$8 sps:$4 sm:$0xff]  }
  0x68   :  { %778 = vmatpush1.bf16.msra.mxu0 %v1914_v6  ;;  %769 = vmatmul.mubr.bf16.vlgmr.msra.gmra.mxu1 %v1586_v7  ;;  %v2006_v6 = vld [vmem:[#allocation5 + $0xb0] ss:$8 sps:$4 sm:$0xff]   ;;  %v2011_v7 = vld [vmem:[#allocation5 + $0xa4] ss:$8 sps:$4 sm:$0xff]  }
  0x69   :  { %779 = vmatprep.subr.bf16.mxu0 %v1921_v8  ;;  %833 = vmatpush1.bf16.msra.mxu1 %v1961_v10  ;;  %v2009_v8 = vld [vmem:[#allocation5 + $0xa0] ss:$8 sps:$4 sm:$0xff]   ;;  %v2012_v10 = vld [vmem:[#allocation5 + $0x90] ss:$8 sps:$4 sm:$0xff]  }
  0x6a   :  { %850 = vmatprep.mubr.bf16.mxu1 %v2175_v16  ;;  %809 = vmatprep.mubr.bf16.mxu0 %v1589_v14  ;;  %v2020_v14 = vld [vmem:[#allocation5 + $0x174] ss:$8 sps:$4 sm:$0xff]   ;;  %v2021_v16 = vld [vmem:[#allocation5 + $0x160] ss:$8 sps:$4 sm:$0xff]  }
  0x6b   :  { %1078 = vmatprep.subr.bf16.mxu1 %v1972_v46 }
  0x6c   :  { %780 = vmatpush1.bf16.msra.mxu0 %v1919_v11  ;;  %v2015_v11 = vld [vmem:[#allocation5 + $0x80] ss:$8 sps:$4 sm:$0xff]  }
  0x6d   :  { %781 = vmatprep.subr.bf16.mxu0 %v1924_v13  ;;  %v2018_v13 = vld [vmem:[#allocation5 + $0x170] ss:$8 sps:$4 sm:$0xff]  }
  0x70   :  { %782 = vmatpush1.bf16.msra.mxu0 %v1922_v15  ;;  %1689 = vmatmul.mubr.msk.bf16.vlgmr.msra.gmra.mxu1 %vm691_vm0, %v1967_v18  ;;  %v2023_v15 = vld [vmem:[#allocation5 + $0x164] ss:$8 sps:$4 sm:$0xff]   ;;  %v2024_v18 = vld [vmem:[#allocation5 + $0x150] ss:$8 sps:$4 sm:$0xff]  }
  0x71   :  { %783 = vmatprep.subr.bf16.mxu0 %v1927_v17  ;;  %1079 = vmatpush1.bf16.msra.mxu1 %v1970_v45  ;;  %v2026_v17 = vld [vmem:[#allocation5 + $0x154] ss:$8 sps:$4 sm:$0xff]  }
  0x72   :  { %1080 = vmatprep.subr.bf16.mxu1 %v1975_v47 }
  0x74   :  { %784 = vmatpush1.bf16.msra.mxu0 %v1925_v19  ;;  %v2029_v19 = vld [vmem:[#allocation5 + $0x144] ss:$8 sps:$4 sm:$0xff]  }
  0x75   :  { %785 = vmatprep.subr.bf16.mxu0 %v1930_v20  ;;  %1081 = vmatpush1.bf16.msra.mxu1 %v1973_v48  ;;  %v2027_v20 = vld [vmem:[#allocation5 + $0x140] ss:$8 sps:$4 sm:$0xff]  }
  0x76   :  { %1082 = vmatprep.subr.bf16.mxu1 %v1978_v49  ;;  %v167_v49 = vlaneseq }
  0x78   :  { %786 = vmatpush1.bf16.msra.mxu0 %v1928_v21  ;;  %v2032_v21 = vld [vmem:[#allocation5 + $0x134] ss:$8 sps:$4 sm:$0xff]  }
  0x79   :  { %787 = vmatprep.subr.bf16.mxu0 %v1933_v22  ;;  %1083 = vmatpush1.bf16.msra.mxu1 %v1976_v50  ;;  %v2030_v22 = vld [vmem:[#allocation5 + $0x130] ss:$8 sps:$4 sm:$0xff]   ;;  %v168_v50 = vshrl.u32 %v167_v49, 7 }
  0x7a   :  { %1084 = vmatprep.subr.bf16.mxu1 %v1981_v51 }
  0x7b   :  { %v2234_v51 = vsub.s32 0, %v168_v50 }
  0x7c   :  { %788 = vmatpush1.bf16.msra.mxu0 %v1931_v23  ;;  %v2035_v23 = vld [vmem:[#allocation5 + $0x124] ss:$8 sps:$4 sm:$0xff]  }
  0x7d   :  { %789 = vmatprep.subr.bf16.mxu0 %v1936_v24  ;;  %1085 = vmatpush1.bf16.msra.mxu1 %v1979_v52  ;;  %v2033_v24 = vld [vmem:[#allocation5 + $0x120] ss:$8 sps:$4 sm:$0xff]   ;;  %v165_v52 = vld [vmem:[%s2263_s4] ss:$4 sm:$0x3] }
  0x7e   :  { %1086 = vmatprep.subr.bf16.mxu1 %v1984_v53  ;;  %v2239_v53 = vsub.s32 1, %v168_v50 }
  0x80   :  { %790 = vmatpush1.bf16.msra.mxu0 %v1934_v25  ;;  %v2038_v25 = vld [vmem:[#allocation5 + $0x114] ss:$8 sps:$4 sm:$0xff]  }
  0x81   :  { %791 = vmatprep.subr.bf16.mxu0 %v1939_v26  ;;  %1087 = vmatpush1.bf16.msra.mxu1 %v1982_v54  ;;  %v2036_v26 = vld [vmem:[#allocation5 + $0x110] ss:$8 sps:$4 sm:$0xff]   ;;  %v170_v54 = vrot.slane %v165_v52, %v2234_v51 }
  0x82   :  { %1088 = vmatprep.subr.bf16.mxu1 %v1987_v55  ;;  %v174_v55 = vrot.slane %v165_v52, %v2239_v53 }
  0x84   :  { %792 = vmatpush1.bf16.msra.mxu0 %v1937_v27  ;;  %v2041_v27 = vld [vmem:[#allocation5 + $0x104] ss:$8 sps:$4 sm:$0xff]  }
  0x85   :  { %793 = vmatprep.subr.bf16.mxu0 %v1942_v28  ;;  %1089 = vmatpush1.bf16.msra.mxu1 %v1985_v56  ;;  %v2039_v28 = vld [vmem:[#allocation5 + $0x100] ss:$8 sps:$4 sm:$0xff]  }
  0x86   :  { %1090 = vmatprep.subr.bf16.mxu1 %v1990_v57 }
  0x88   :  { %794 = vmatpush2.bf16.msra.mxu0 %v1940_v29  ;;  %v2044_v29 = vld [vmem:[#allocation5 + $0x1f4] ss:$8 sps:$4 sm:$0xff]  }
  0x89   :  { %795 = vmatprep.subr.bf16.mxu0 %v1945_v30  ;;  %1091 = vmatpush1.bf16.msra.mxu1 %v1988_v58  ;;  %v2042_v30 = vld [vmem:[#allocation5 + $0x1f0] ss:$8 sps:$4 sm:$0xff]  }
  0x8a   :  { %1092 = vmatprep.subr.bf16.mxu1 %v1993_v59 }
  0x8c   :  { %796 = vmatpush2.bf16.msra.mxu0 %v1943_v31  ;;  %v2047_v31 = vld [vmem:[#allocation5 + $0x1e4] ss:$8 sps:$4 sm:$0xff]  }
  0x8d   :  { %797 = vmatprep.subr.bf16.mxu0 %v1948_v32  ;;  %1093 = vmatpush1.bf16.msra.mxu1 %v1991_v60  ;;  %v2045_v32 = vld [vmem:[#allocation5 + $0x1e0] ss:$8 sps:$4 sm:$0xff]  }
  0x8e   :  { %1094 = vmatprep.subr.bf16.mxu1 %v1996_v61 }
  0x90   :  { %798 = vmatpush2.bf16.msra.mxu0 %v1946_v33  ;;  %v2050_v33 = vld [vmem:[#allocation5 + $0x1d4] ss:$8 sps:$4 sm:$0xff]  }
  0x91   :  { %799 = vmatprep.subr.bf16.mxu0 %v1951_v34  ;;  %1095 = vmatpush2.bf16.msra.mxu1 %v1994_v62  ;;  %v2048_v34 = vld [vmem:[#allocation5 + $0x1d0] ss:$8 sps:$4 sm:$0xff]  }
  0x92   :  { %1096 = vmatprep.subr.bf16.mxu1 %v1999_v63 }
  0x94   :  { %800 = vmatpush2.bf16.msra.mxu0 %v1949_v35  ;;  %v2053_v35 = vld [vmem:[#allocation5 + $0x1c4] ss:$8 sps:$4 sm:$0xff]  }
  0x95   :  { %801 = vmatprep.subr.bf16.mxu0 %v1954_v36  ;;  %1097 = vmatpush2.bf16.msra.mxu1 %v1997_v0  ;;  %v2051_v36 = vld [vmem:[#allocation5 + $0x1c0] ss:$8 sps:$4 sm:$0xff]  }
  0x96   :  { %1098 = vmatprep.subr.bf16.mxu1 %v2002_v1 }
  0x98   :  { %802 = vmatpush2.bf16.msra.mxu0 %v1952_v37 }
  0x99   :  { %803 = vmatprep.subr.bf16.mxu0 %v1957_v38  ;;  %1099 = vmatpush2.bf16.msra.mxu1 %v2000_v2 }
  0x9a   :  { %1100 = vmatprep.subr.bf16.mxu1 %v2005_v3 }
  0x9c   :  { %804 = vmatpush2.bf16.msra.mxu0 %v1955_v39 }
  0x9d   :  { %805 = vmatprep.subr.bf16.mxu0 %v1960_v40  ;;  %1101 = vmatpush2.bf16.msra.mxu1 %v2003_v4 }
  0x9e   :  { %1102 = vmatprep.subr.bf16.mxu1 %v2008_v5 }
  0xa0   :  { %806 = vmatpush2.bf16.msra.mxu0 %v1958_v41 }
  0xa1   :  { %807 = vmatprep.subr.bf16.mxu0 %v1966_v42  ;;  %1103 = vmatpush2.bf16.msra.mxu1 %v2006_v6 }
  0xa2   :  { %1104 = vmatprep.subr.bf16.mxu1 %v2011_v7 }
  0xa4   :  { %808 = vmatpush2.bf16.msra.mxu0 %v1964_v43 }
  0xa5   :  { %1105 = vmatpush2.bf16.msra.mxu1 %v2009_v8  ;;  %1339 = vmatprep.subr.bf16.mxu0 %v2020_v14 }
  0xa6   :  { %1106 = vmatprep.subr.bf16.mxu1 %v2014_v9 }
  0xa7   :  { %810 = vmatmul.mubr.bf16.vlgmr.msra.gmra.mxu0 %v1588_v44 }
  0xa8   :  { %1340 = vmatpush1.bf16.msra.mxu0 %v2018_v13 }
  0xa9   :  { %1107 = vmatpush2.bf16.msra.mxu1 %v2012_v10  ;;  %1341 = vmatprep.subr.bf16.mxu0 %v2023_v15 }
  0xaa   :  { %1108 = vmatprep.subr.bf16.mxu1 %v2017_v12 }
  0xac   :  { %1342 = vmatpush1.bf16.msra.mxu0 %v2021_v16 }
  0xad   :  { %1109 = vmatpush2.bf16.msra.mxu1 %v2015_v11  ;;  %1343 = vmatprep.subr.bf16.mxu0 %v2026_v17 }
  0xb0   :  { %1344 = vmatpush1.bf16.msra.mxu0 %v2024_v18  ;;  %v2056_v18 = vld [vmem:[#allocation5 + $0x1b4] ss:$8 sps:$4 sm:$0xff]  }
  0xb1   :  { %1345 = vmatprep.subr.bf16.mxu0 %v2029_v19  ;;  %v2054_v19 = vld [vmem:[#allocation5 + $0x1b0] ss:$8 sps:$4 sm:$0xff]  }
  0xb4   :  { %1346 = vmatpush1.bf16.msra.mxu0 %v2027_v20  ;;  %v2059_v20 = vld [vmem:[#allocation5 + $0x1a4] ss:$8 sps:$4 sm:$0xff]  }
  0xb5   :  { %1347 = vmatprep.subr.bf16.mxu0 %v2032_v21  ;;  %v2057_v21 = vld [vmem:[#allocation5 + $0x1a0] ss:$8 sps:$4 sm:$0xff]  }
  0xb8   :  { %1348 = vmatpush1.bf16.msra.mxu0 %v2030_v22  ;;  %v2062_v22 = vld [vmem:[#allocation5 + $0x194] ss:$8 sps:$4 sm:$0xff]  }
  0xb9   :  { %1349 = vmatprep.subr.bf16.mxu0 %v2035_v23  ;;  %v2060_v23 = vld [vmem:[#allocation5 + $0x190] ss:$8 sps:$4 sm:$0xff]  }
  0xbc   :  { %1350 = vmatpush1.bf16.msra.mxu0 %v2033_v24  ;;  %v2065_v24 = vld [vmem:[#allocation5 + $0x184] ss:$8 sps:$4 sm:$0xff]  }
  0xbd   :  { %1351 = vmatprep.subr.bf16.mxu0 %v2038_v25  ;;  %v2063_v25 = vld [vmem:[#allocation5 + $0x180] ss:$8 sps:$4 sm:$0xff]  }
  0xc0   :  { %1352 = vmatpush1.bf16.msra.mxu0 %v2036_v26  ;;  %v2066_v26 = vld [vmem:[#allocation7 + $0x78] sm:$0xff]  }
  0xc1   :  { %1353 = vmatprep.subr.bf16.mxu0 %v2041_v27  ;;  %v2067_v27 = vld [vmem:[#allocation7 + $0x38] sm:$0xff]   ;;  %1785 = vmatprep.subr.bf16.mxu1 %v2066_v26 }
  0xc4   :  { %1354 = vmatpush1.bf16.msra.mxu0 %v2039_v28  ;;  %v2068_v28 = vld [vmem:[#allocation7 + $0x70] sm:$0xff]  }
  0xc5   :  { %1355 = vmatprep.subr.bf16.mxu0 %v2044_v29  ;;  %v2069_v29 = vld [vmem:[#allocation7 + $0x30] sm:$0xff]  }
  0xc8   :  { %1356 = vmatpush2.bf16.msra.mxu0 %v2042_v30  ;;  %v2070_v30 = vld [vmem:[#allocation7 + $0x68] sm:$0xff]  }
  0xc9   :  { %1357 = vmatprep.subr.bf16.mxu0 %v2047_v31  ;;  %v2071_v31 = vld [vmem:[#allocation7 + $0x28] sm:$0xff]  }
  0xcc   :  { %1358 = vmatpush2.bf16.msra.mxu0 %v2045_v32  ;;  %v2072_v32 = vld [vmem:[#allocation7 + $0x60] sm:$0xff]  }
  0xcd   :  { %1359 = vmatprep.subr.bf16.mxu0 %v2050_v33  ;;  %v2073_v33 = vld [vmem:[#allocation7 + $0x20] sm:$0xff]  }
  0xd0   :  { %1360 = vmatpush2.bf16.msra.mxu0 %v2048_v34  ;;  %v1694_v34 = vld [vmem:[%s2263_s4 + $0x1] ss:$4 sm:$0x3] }
  0xd1   :  { %1361 = vmatprep.subr.bf16.mxu0 %v2053_v35  ;;  %v911_v35 = vrot.slane %v1694_v34, %v2234_v51 }
  0xd4   :  { %1362 = vmatpush2.bf16.msra.mxu0 %v2051_v36  ;;  %v915_v36 = vrot.slane %v1694_v34, %v2239_v53 }
  0xd5   :  { %1363 = vmatprep.subr.bf16.mxu0 %v2056_v18 }
  0xd8   :  { %1364 = vmatpush2.bf16.msra.mxu0 %v2054_v19 }
  0xd9   :  { %1365 = vmatprep.subr.bf16.mxu0 %v2059_v20 }
  0xdc   :  { %1366 = vmatpush2.bf16.msra.mxu0 %v2057_v21 }
  0xdd   :  { %1367 = vmatprep.subr.bf16.mxu0 %v2062_v22 }
  0xe0   :  { %1368 = vmatpush2.bf16.msra.mxu0 %v2060_v23 }
  0xe1   :  { %1369 = vmatprep.subr.bf16.mxu0 %v2065_v24 }
  0xe4   :  { %1370 = vmatpush2.bf16.msra.mxu0 %v2063_v25  ;;  %v1768_v25 = vld [vmem:[%s2263_s4 + $0x3] ss:$0 sm:$0xff] }
 0x127   :  { %v729_v37 = vpop.f32.mrf.mxu0 }
 0x128   :  { %v770_v39 = vpop.f32.mrf.mxu1  ;;  %v730_v56 = vadd.f32 %v729_v37, %v170_v54 }
 0x129   :  { %v731_v38 = vpop.f32.mrf.mxu0 }
 0x12a   :  { %v772_v41 = vpop.f32.mrf.mxu1  ;;  %v732_v57 = vadd.f32 %v731_v38, %v174_v55  ;;  %v771_v58 = vadd.f32 %v770_v39, %v730_v56 }
 0x12b   :  { %v733_v40 = vpop.f32.mrf.mxu0 }
 0x12c   :  { %v774_v43 = vpop.f32.mrf.mxu1  ;;  %v773_v60 = vadd.f32 %v772_v41, %v732_v57 }
 0x12d   :  { %v734_v42 = vpop.f32.mrf.mxu0 }
 0x12e   :  { %v775_v44 = vpop.f32.mrf.mxu1 }
 0x130   :  { %v852_v45 = vpop.f32.mrf.mxu1 }
 0x132   :  { %v854_v46 = vpop.f32.mrf.mxu1 }
 0x134   :  { %v856_v47 = vpop.f32.mrf.mxu1 }
 0x136   :  { %v857_v48 = vpop.f32.mrf.mxu1 }
 0x167   :  { %v811_v59 = vpop.f32.mrf.mxu0 }
 0x168   :  { %v812_v61 = vadd.f32 %v811_v59, %v771_v58  ;;  %v2074_v59 = vld [vmem:[#allocation7 + $0x58] sm:$0xff]  }
 0x169   :  { %v813_v62 = vpop.f32.mrf.mxu0 }
 0x16a   :  { %v853_v63 = vadd.f32 %v852_v45, %v812_v61  ;;  %v814_v0 = vadd.f32 %v813_v62, %v773_v60  ;;  %v2075_v60 = vld [vmem:[#allocation7 + $0x18] sm:$0xff]   ;;  %v2076_v61 = vld [vmem:[#allocation7 + $0x50] sm:$0xff]  }
 0x16b   :  { %v815_v1 = vpop.f32.mrf.mxu0  ;;  %v2077_v62 = vld [vmem:[#allocation7 + $0x10] sm:$0xff]  }
 0x16c   :  { %v863_v2 = vsub.f32 0.0, %v853_v63  ;;  %v855_v3 = vadd.f32 %v854_v46, %v814_v0  ;;  %v1690_v4 = vadd.f32 -0.5, %v853_v63  ;;  %v2078_v63 = vld [vmem:[#allocation7 + $0x48] sm:$0xff]   ;;  %v2080_v1 = vld [vmem:[#allocation7 + $0x40] sm:$0xff]  }
 0x16d   :  { %v816_v5 = vpop.f32.mrf.mxu0  ;;  %v2079_v0 = vld [vmem:[#allocation7 + $0x8] sm:$0xff]  }
 0x16e   :  { %v1692_v6 = vadd.f32 -0.5, %v863_v2  ;;  %v1691_v7 = vadd.f32 -0.5, %v855_v3  ;;  %v864_v8 = vsub.f32 0.0, %v855_v3  ;;  %v861_v11 = vmax.f32 %v1690_v4, 0.0  ;;  %v2081_v2 = vld [vmem:[#allocation7] sm:$0xff]  }
 0x16f   :  { %v1731_v3 = vld [vmem:[%s2263_s4 + $0x2] ss:$4 sm:$0x3] }
 0x170   :  { %v867_v9 = vmax.f32 %v1692_v6, 0.0  ;;  %v1693_v10 = vadd.f32 -0.5, %v864_v8  ;;  %v862_v12 = vmax.f32 %v1691_v7, 0.0  ;;  %v1172_v4 = vrot.slane %v1731_v3, %v2234_v51 }
 0x171   :  { %v1176_v5 = vrot.slane %v1731_v3, %v2239_v53 }
 0x172   :  { %v868_v13 = vmax.f32 %v1693_v10, 0.0  ;;  %v869_v14 = vsub.f32 %v861_v11, %v867_v9 }
 0x174   :  { %v870_v15 = vsub.f32 %v862_v12, %v868_v13  ;;  %v871_v17 = vpack.c.bf16 %v869_v14, %v869_v14 }
 0x176   :  { %v872_v16 = vpack.c.bf16 %v870_v15, %v870_v15 }
 0x178   :  { %1110 = vmatprep.mubr.bf16.mxu1 %v872_v16 }
 0x179   :  { %1111 = vmatmul.mubr.bf16.vlgmr.msra.gmra.mxu1 %v871_v17 }
 0x17a   :  { %1786 = vmatpush3.bf16.msra.mxu1 %v2067_v27 }
 0x17b   :  { %1787 = vmatprep.subr.bf16.mxu1 %v2068_v28 }
 0x17e   :  { %1788 = vmatpush3.bf16.msra.mxu1 %v2069_v29 }
 0x17f   :  { %1789 = vmatprep.subr.bf16.mxu1 %v2070_v30 }
 0x182   :  { %1790 = vmatpush3.bf16.msra.mxu1 %v2071_v31 }
 0x183   :  { %1791 = vmatprep.subr.bf16.mxu1 %v2072_v32 }
 0x186   :  { %1792 = vmatpush3.bf16.msra.mxu1 %v2073_v33 }
 0x187   :  { %1793 = vmatprep.subr.bf16.mxu1 %v2074_v59 }
 0x18a   :  { %1794 = vmatpush3.bf16.msra.mxu1 %v2075_v60 }
 0x18b   :  { %1795 = vmatprep.subr.bf16.mxu1 %v2076_v61 }
 0x18e   :  { %1796 = vmatpush3.bf16.msra.mxu1 %v2077_v62 }
 0x18f   :  { %1797 = vmatprep.subr.bf16.mxu1 %v2078_v63 }
 0x192   :  { %1798 = vmatpush3.bf16.msra.mxu1 %v2079_v0 }
 0x193   :  { %1799 = vmatprep.subr.bf16.mxu1 %v2080_v1 }
 0x196   :  { %1800 = vmatpush3.bf16.msra.mxu1 %v2081_v2 }
 0x239   :  { %v1112_v37 = vpop.f32.mrf.mxu1 }
 0x23a   :  { %v1113_v38 = vadd.f32 %v1112_v37, %v911_v35 }
 0x23b   :  { %v1114_v39 = vpop.f32.mrf.mxu1 }
 0x23c   :  { %v1123_v40 = vsub.f32 0.0, %v1113_v38  ;;  %v1115_v41 = vadd.f32 %v1114_v39, %v915_v36  ;;  %v1727_v42 = vadd.f32 -0.5, %v1113_v38 }
 0x23d   :  { %v1116_v43 = vpop.f32.mrf.mxu1 }
 0x23e   :  { %v1729_v44 = vadd.f32 -0.5, %v1123_v40  ;;  %v1728_v45 = vadd.f32 -0.5, %v1115_v41  ;;  %v1124_v46 = vsub.f32 0.0, %v1115_v41  ;;  %v1121_v50 = vmax.f32 %v1727_v42, 0.0 }
 0x23f   :  { %v1117_v47 = vpop.f32.mrf.mxu1 }
 0x240   :  { %v1127_v48 = vmax.f32 %v1729_v44, 0.0  ;;  %v1730_v49 = vadd.f32 -0.5, %v1124_v46  ;;  %v1122_v52 = vmax.f32 %v1728_v45, 0.0 }
 0x242   :  { %v1128_v54 = vmax.f32 %v1730_v49, 0.0  ;;  %v1129_v55 = vsub.f32 %v1121_v50, %v1127_v48 }
 0x244   :  { %v1130_v56 = vsub.f32 %v1122_v52, %v1128_v54  ;;  %v1131_v58 = vpack.c.bf16 %v1129_v55, %v1129_v55 }
 0x246   :  { %v1132_v57 = vpack.c.bf16 %v1130_v56, %v1130_v56 }
 0x248   :  { %1371 = vmatprep.mubr.bf16.mxu0 %v1132_v57 }
 0x249   :  { %1372 = vmatmul.mubr.bf16.vlgmr.msra.gmra.mxu0 %v1131_v58 }
 0x309   :  { %v1373_v6 = vpop.f32.mrf.mxu0 }
 0x30a   :  { %v1374_v7 = vadd.f32 %v1373_v6, %v1172_v4 }
 0x30b   :  { %v1375_v8 = vpop.f32.mrf.mxu0 }
 0x30c   :  { %v1384_v9 = vsub.f32 0.0, %v1374_v7  ;;  %v1376_v10 = vadd.f32 %v1375_v8, %v1176_v5  ;;  %v1764_v11 = vadd.f32 -0.5, %v1374_v7 }
 0x30d   :  { %v1377_v12 = vpop.f32.mrf.mxu0 }
 0x30e   :  { %v1766_v13 = vadd.f32 -0.5, %v1384_v9  ;;  %v1765_v14 = vadd.f32 -0.5, %v1376_v10  ;;  %v1385_v15 = vsub.f32 0.0, %v1376_v10  ;;  %v1382_v19 = vmax.f32 %v1764_v11, 0.0 }
 0x30f   :  { %v1378_v16 = vpop.f32.mrf.mxu0 }
 0x310   :  { %v1388_v17 = vmax.f32 %v1766_v13, 0.0  ;;  %v1767_v18 = vadd.f32 -0.5, %v1385_v15  ;;  %v1383_v20 = vmax.f32 %v1765_v14, 0.0 }
 0x312   :  { %v1389_v21 = vmax.f32 %v1767_v18, 0.0  ;;  %v1390_v22 = vsub.f32 %v1382_v19, %v1388_v17 }
 0x314   :  { %v1391_v51 = vsub.f32 %v1383_v20, %v1389_v21  ;;  %v1392_v53 = vpack.c.bf16 %v1390_v22, %v1390_v22 }
 0x316   :  { %v1393_v23 = vpack.c.bf16 %v1391_v51, %v1391_v51 }
 0x318   :  { %1559 = vmatprep.mubr.bf16.mxu1 %v1393_v23 }
 0x319   :  { %1560 = vmatmul.mubr.bf16.vlgmr.msra.gmra.mxu1 %v1392_v53 }
 0x3d9   :  { %v1801_v24 = vpop.f32.mrf.mxu1 }
 0x3db   :  { %v1802_v26 = vpop.f32.mrf.mxu1 }
 0x3dc   :  { %v1803_v27 = vadd.f32 %v1802_v26, %v1801_v24 }
 0x3dd   :  { %v1804_v28 = vpop.f32.mrf.mxu1 }
 0x3de   :  { %v1562_v29 = vadd.f32 %v1803_v27, %v1768_v25 }
 0x3df   :  { %v1805_v30 = vpop.f32.mrf.mxu1 }
 0x3e0   :  { %1567 = vst [vmem:[#allocation8] sm:$0xff] %v1562_v29 }
 0x3e1   :  { %2153 = shalt.err (!%p2150_p5)
}
 0x3e2   :  { %1577 = dma.vmem_to_hbm [thread:$0]  %s1575_s25, 128, %s2264_s5, [#allocation4]  }
 0x3e3   :  { %2166 = dma.done.wait [#allocation4], 128  }
 0x3e4   :  { %2167 = vsyncadd [#allocation4], 4294967168 }
 0x3e5   :  { %1581 = vsyncpa [#allocation3], 1 }
 0x3e6   :  { %1582 = vsyncpa [#allocation6], 1 }
 0x3e7   :  { %1583 = vsyncpa [#allocation4], 1 }

</bundles_post_ra>
